<compile_context>
chip_gen: v7x
topology: tpu7x:2x2x1
jax: 0.10.0
libtpu: 0.0.40
codegen_flags: <defaults>
</compile_context>

<pallas_src>
import functools

import jax
import jax.numpy as jnp
from jax import lax
from jax.experimental import pallas as pl
from jax.experimental.pallas import tpu as pltpu


def _edge_extract_kernel(x_ref, out_ref, *, H, W):
    # x_ref / out_ref: (TB, H*W) blocks; each row is one flattened spatial plane.
    x = x_ref[...].astype(jnp.float32)              # upcast inside the kernel
    TB, HW = x.shape
    neg_inf = jnp.float32(-jnp.inf)

    flat = lax.broadcasted_iota(jnp.int32, (TB, HW), 1)
    col = flat % W                                   # power-of-2 W lowers to AND

    # ---- horizontal pass: max over the 3-wide row window ---------------------
    # neighbor (i, j+1) lives at flat index f+1  -> roll so result[f] = x[f+1]
    right = pltpu.roll(x, shift=(HW - 1) % HW, axis=1)
    right = jnp.where(col == W - 1, neg_inf, right)
    # neighbor (i, j-1) lives at flat index f-1  -> roll so result[f] = x[f-1]
    left = pltpu.roll(x, shift=1 % HW, axis=1)
    left = jnp.where(col == 0, neg_inf, left)
    hmax = jnp.maximum(x, jnp.maximum(right, left))

    # ---- vertical pass: max over the 3-tall column window of hmax ------------
    down = pltpu.roll(hmax, shift=(HW - W) % HW, axis=1)     # value from row i+1
    down = jnp.where(flat >= HW - W, neg_inf, down)          # last spatial row
    up = pltpu.roll(hmax, shift=W % HW, axis=1)              # value from row i-1
    up = jnp.where(flat < W, neg_inf, up)                    # first spatial row
    pooled = jnp.maximum(hmax, jnp.maximum(down, up))

    # pooled >= x, so |x - pooled| == pooled - x (>= 0), masked_fill(~bool, 0)
    # is a no-op, and .long() is a simple truncating cast.
    out_ref[...] = (pooled - x).astype(out_ref.dtype)


def _planes_per_block(n, hw, elem_bytes=4, target_bytes=2 << 20):
    """Choose TB (planes per grid step). TB must be a multiple of 8 or == n."""
    cap = max(1, target_bytes // max(1, hw * elem_bytes))
    if n <= cap:
        # Everything fits in one block; split in two for 2-TensorCore sharding
        # (v7x megacore) when that still yields legal, reasonably sized blocks.
        if n >= 16 and n % 2 == 0 and (n // 2) % 8 == 0:
            return n // 2
        return n
    best = None
    tb = 8
    while tb <= cap:
        if n % tb == 0:
            best = tb
        tb += 8
    return best if best is not None else n


def edge_extract(x, out_dtype=jnp.int32):
    """Pallas implementation of EdgeExtract.forward.

    x: (B, C, H, W), any real dtype.  Returns (B, C, H, W) of `out_dtype`.
    PyTorch's .long() is int64; JAX defaults to 32-bit and edge magnitudes are
    tiny, so int32 is a documented, benign deviation.  Pass out_dtype=jnp.int8
    to cut writeback bytes further when downstream allows it.
    """
    B, C, H, W = x.shape
    N, HW = B * C, H * W
    xr = x.reshape(N, HW)                            # free reshape, no dtype cast

    TB = _planes_per_block(N, HW)
    grid = (N // TB,)

    kernel = functools.partial(_edge_extract_kernel, H=H, W=W)
    out = pl.pallas_call(
        kernel,
        out_shape=jax.ShapeDtypeStruct((N, HW), out_dtype),
        grid=grid,
        in_specs=[pl.BlockSpec((TB, HW), lambda i: (i, 0))],
        out_specs=pl.BlockSpec((TB, HW), lambda i: (i, 0)),
        compiler_params=pltpu.CompilerParams(
            dimension_semantics=("parallel",)),
    )(xr)

    # TODO(synk): add intra-plane tiling (H-tiles with a 1-row halo) for images
    # whose single (1, H*W) plane alone would not fit VMEM (e.g. 4k x 4k planes).
    return out.reshape(B, C, H, W)


if __name__ == "__main__":
    key = jax.random.PRNGKey(0)
    B, C, H, W = 2, 4, 16, 16
    u = jax.random.uniform(key, (B, C, H, W), dtype=jnp.float32)
    # Binary-ish input (like the gt mask in LAMLoss) so edges are non-trivial.
    x = jnp.where(u > 0.5, 1.0, 0.0)

    edge = edge_extract(x)
    jax.block_until_ready(edge)

    # Pure-JAX reference: 3x3 max pool (stride 1, -inf padding), then |x - pool|.
    xf = x.astype(jnp.float32)
    pooled = lax.reduce_window(
        xf, -jnp.inf, lax.max,
        window_dimensions=(1, 1, 3, 3), window_strides=(1, 1, 1, 1),
        padding=((0, 0), (0, 0), (1, 1), (1, 1)))
    ref = jnp.abs(xf - pooled).astype(jnp.int32)

    assert edge.shape == (B, C, H, W)
    assert edge.dtype == jnp.int32
    assert bool(jnp.array_equal(edge, ref))
    print("KERNEL_OK")
</pallas_src>

<mosaic_0001>
module attributes {stable_mosaic.version = 11 : i64} {
  func.func @_edge_extract_kernel(%arg0: i32, %arg1: memref<8x256xf32, #tpu.memory_space<vmem>>, %arg2: memref<8x256xi32, #tpu.memory_space<vmem>>) attributes {dimension_semantics = [#tpu.dimension_semantics<parallel>], iteration_bounds = array<i64: 1>, scalar_prefetch = 0 : i64, scratch_operands = 0 : i64, tpu.core_type = #tpu.core_type<tc>, window_params = [{transform_indices = @transform_0, window_bounds = array<i64: 8, 256>}, {transform_indices = @transform_1, window_bounds = array<i64: 8, 256>}]} {
    %c0 = arith.constant 0 : index
    %c0_0 = arith.constant 0 : index
    %0 = vector.load %arg1[%c0, %c0_0] : memref<8x256xf32, #tpu.memory_space<vmem>>, vector<8x256xf32>
    %1 = tpu.iota {dimensions = array<i32: 1>} : vector<8x256xi32>
    %c16_i32 = arith.constant 16 : i32
    %c0_i32 = arith.constant 0 : i32
    %2 = arith.cmpi eq, %c16_i32, %c0_i32 : i32
    %c1_i32 = arith.constant 1 : i32
    %3 = arith.select %2, %c1_i32, %c16_i32 : i32
    %4 = vector.broadcast %3 : i32 to vector<8x256xi32>
    %5 = arith.remsi %1, %4 : vector<8x256xi32>
    %c0_i32_1 = arith.constant 0 : i32
    %6 = vector.broadcast %c0_i32_1 : i32 to vector<8x256xi32>
    %7 = arith.cmpi ne, %5, %6 : vector<8x256xi32>
    %c0_i32_2 = arith.constant 0 : i32
    %8 = vector.broadcast %c0_i32_2 : i32 to vector<8x256xi32>
    %9 = arith.cmpi slt, %5, %8 : vector<8x256xi32>
    %c0_i32_3 = arith.constant 0 : i32
    %10 = arith.cmpi slt, %3, %c0_i32_3 : i32
    %11 = vector.broadcast %10 : i1 to vector<8x256xi1>
    %12 = vector.broadcast %11 : vector<8x256xi1> to vector<8x256xi1>
    %13 = arith.xori %9, %12 : vector<8x256xi1>
    %14 = arith.andi %13, %7 : vector<8x256xi1>
    %15 = vector.broadcast %3 : i32 to vector<8x256xi32>
    %16 = arith.addi %5, %15 : vector<8x256xi32>
    %17 = arith.select %14, %16, %5 : vector<8x256xi1>, vector<8x256xi32>
    %c255_i32 = arith.constant 255 : i32
    %18 = tpu.dynamic_rotate %0 by %c255_i32 dim 1 : vector<8x256xf32>, i32 -> vector<8x256xf32>
    %c15_i32 = arith.constant 15 : i32
    %19 = vector.broadcast %c15_i32 : i32 to vector<8x256xi32>
    %20 = arith.cmpi eq, %17, %19 : vector<8x256xi32>
    %cst = arith.constant 0xFF800000 : f32
    %21 = vector.broadcast %cst : f32 to vector<8x256xf32>
    %22 = arith.select %20, %21, %18 : vector<8x256xi1>, vector<8x256xf32>
    %c1_i32_4 = arith.constant 1 : i32
    %23 = tpu.dynamic_rotate %0 by %c1_i32_4 dim 1 : vector<8x256xf32>, i32 -> vector<8x256xf32>
    %c0_i32_5 = arith.constant 0 : i32
    %24 = vector.broadcast %c0_i32_5 : i32 to vector<8x256xi32>
    %25 = arith.cmpi eq, %17, %24 : vector<8x256xi32>
    %cst_6 = arith.constant 0xFF800000 : f32
    %26 = vector.broadcast %cst_6 : f32 to vector<8x256xf32>
    %27 = arith.select %25, %26, %23 : vector<8x256xi1>, vector<8x256xf32>
    %28 = arith.maximumf %22, %27 : vector<8x256xf32>
    %29 = arith.maximumf %0, %28 : vector<8x256xf32>
    %c240_i32 = arith.constant 240 : i32
    %30 = tpu.dynamic_rotate %29 by %c240_i32 dim 1 : vector<8x256xf32>, i32 -> vector<8x256xf32>
    %c240_i32_7 = arith.constant 240 : i32
    %31 = vector.broadcast %c240_i32_7 : i32 to vector<8x256xi32>
    %32 = arith.cmpi sge, %1, %31 : vector<8x256xi32>
    %cst_8 = arith.constant 0xFF800000 : f32
    %33 = vector.broadcast %cst_8 : f32 to vector<8x256xf32>
    %34 = arith.select %32, %33, %30 : vector<8x256xi1>, vector<8x256xf32>
    %c16_i32_9 = arith.constant 16 : i32
    %35 = tpu.dynamic_rotate %29 by %c16_i32_9 dim 1 : vector<8x256xf32>, i32 -> vector<8x256xf32>
    %c16_i32_10 = arith.constant 16 : i32
    %36 = vector.broadcast %c16_i32_10 : i32 to vector<8x256xi32>
    %37 = arith.cmpi slt, %1, %36 : vector<8x256xi32>
    %cst_11 = arith.constant 0xFF800000 : f32
    %38 = vector.broadcast %cst_11 : f32 to vector<8x256xf32>
    %39 = arith.select %37, %38, %35 : vector<8x256xi1>, vector<8x256xf32>
    %40 = arith.maximumf %34, %39 : vector<8x256xf32>
    %41 = arith.maximumf %29, %40 : vector<8x256xf32>
    %42 = arith.subf %41, %0 : vector<8x256xf32>
    %43 = arith.fptosi %42 : vector<8x256xf32> to vector<8x256xi32>
    %c0_12 = arith.constant 0 : index
    %c0_13 = arith.constant 0 : index
    %44 = vector.load %arg2[%c0_12, %c0_13] : memref<8x256xi32, #tpu.memory_space<vmem>>, vector<8x256xi32>
    tpu.vector_store %arg2[%c0_12, %c0_13], %43 {strides = array<i32>} : memref<8x256xi32, #tpu.memory_space<vmem>>, vector<8x256xi32>,
    return
  }
  func.func @transform_0(%arg0: i32) -> (i32, i32) {
    %c0_i32 = arith.constant 0 : i32
    %c0_i32_0 = arith.constant 0 : i32
    return %arg0, %c0_i32 : i32, i32
  }
  func.func @transform_1(%arg0: i32) -> (i32, i32) {
    %c0_i32 = arith.constant 0 : i32
    %c0_i32_0 = arith.constant 0 : i32
    return %arg0, %c0_i32 : i32, i32
  }
}

</mosaic_0001>

<bundles_post_ra>
// kernel: tpu_custom_call.1
= control target key start
LH: loop header
LB: loop body
LE: loop exit
PB: predicated region body
PF: predicated region fallthrough
CT: control target
= control target key end

     0   :  { %6 = vsyncpa [#allocation3], 0  ;;  %s226_s0 = inlined_call_operand.hbm [shape: f32[8,256], index: 0, kind: input, shape index: {}]   ;;  %s227_s1 = inlined_call_operand.hbm [shape: s32[8,256], index: 1, kind: output, shape index: {}]  }
   0x1   :  { %7 = vsyncpa [#allocation4], 0  ;;  %s180_s6 = smov [#allocation2]   ;;  %s132_s10 = scalar_lea.hbm %s226_s0, 256 }
   0x2   :  { %s14_s7 = sshll.u32 %s180_s6, 4  ;;  %p133_p0 = scmp.ne.s32.totalorder %s226_s0, %s132_s10  ;;  %s15_s7 = int_to_ptr.vmem [resolvable:$true] %s14_s7 }
   0x3   :  { %p136_p1 = scmp.lt.u32.totalorder %s132_s10, %s226_s0 }
   0x5   :  { %p138_p2 = pnand %p136_p1, %p133_p0 }
   0x7   :  { %141 = shalt.err (!%p138_p2)
}
   0x8   :  { %s142_s15 = scalar_lea.vmem %s15_s7, 256  ;;  %p147_p4 = scmp.lt.s32.totalorder %s15_s7, %s15_s7 }
   0x9   :  { %p143_p3 = scmp.ne.s32.totalorder %s15_s7, %s142_s15  ;;  %p148_p5 = scmp.lt.s32.totalorder %s142_s15, %s142_s15 }
   0xb   :  { %p149_p6 = por %p148_p5, %p147_p4 }
   0xd   :  { %p150_p7 = pnand %p149_p6, %p143_p3 }
   0xf   :  { %153 = shalt.err (!%p150_p7)
}
  0x10   :  { %17 = dma.hbm_to_vmem [thread:$0]  %s226_s0, 256, %s15_s7, [#allocation3]  }
  0x11   :  { %176 = dma.done.wait [#allocation3], 256  }
  0x12   :  { %177 = vsyncadd [#allocation3], 4294967040  ;;  %v208_v0 = vld [vmem:[#allocation2] sm:$0xff]  ;;  %s181_s18 = smov 1   ;;  %s182_s19 = smov 127   ;;  %v22_v1 = vld [vmem:[#allocation2 + $0x8] sm:$0xff]  ;;  %v23_v2 = vlaneseq }
  0x13   :  { %61 = vrot.lane.b32.xlu1 %v208_v0, %s181_s18  ;;  %50 = vrot.lane.b32.xlu0 %v208_v0, %s182_s19  ;;  %s183_s0 = smov 112   ;;  %s184_s20 = smov 16  }
  0x14   :  { %v24_v3 = vand.u32 127, %v23_v2  ;;  %s185_s21 = smov [#allocation5]  }
  0x15   :  { %s113_s22 = sshll.u32 %s185_s21, 4  ;;  %s114_s22 = int_to_ptr.vmem [resolvable:$true] %s113_s22 }
  0x16   :  { %v25_v4 = vadd.s32 128, %v24_v3  ;;  %v30_v5 = vand.u32 15, %v24_v3  ;;  %vm65_vm0 = vcmp.lt.s32.totalorder %v24_v3, 1  ;;  %vm54_vm1 = vcmp.lt.s32.totalorder %v24_v3, 127  ;;  %s154_s23 = scalar_lea.vmem %s114_s22, 256  ;;  %p159_p9 = scmp.lt.s32.totalorder %s114_s22, %s114_s22 }
  0x17   :  { %63 = vrot.lane.b32.xlu1 %v22_v1, %s181_s18  ;;  %52 = vrot.lane.b32.xlu0 %v22_v1, %s182_s19  ;;  %vm80_vm6 = vcmp.lt.s32.totalorder %v24_v3, 112  ;;  %vm91_vm8 = vcmp.lt.s32.totalorder %v24_v3, 16  ;;  %p155_p8 = scmp.ne.s32.totalorder %s114_s22, %s154_s23  ;;  %p160_p10 = scmp.lt.s32.totalorder %s154_s23, %s154_s23 }
  0x18   :  { %v37_v6 = vand.u32 15, %v25_v4  ;;  %vm68_vm2 = vcmp.eq.s32.totalorder %v30_v5, 0  ;;  %vm57_vm4 = vcmp.eq.s32.totalorder %v30_v5, 15  ;;  %vm84_vm7 = vcmp.ge.s32.totalorder %v25_v4, 240 }
  0x19   :  { %p161_p11 = por %p160_p10, %p159_p9 }
  0x1a   :  { %vm69_vm3 = vcmp.eq.s32.totalorder %v37_v6, 0  ;;  %vm58_vm5 = vcmp.eq.s32.totalorder %v37_v6, 15 }
  0x1b   :  { %p162_p12 = pnand %p161_p11, %p155_p8 }
  0x85   :  { %v62_v7 = vpop.permute.xlu1 %61  ;;  %v51_v8 = vpop.permute.xlu0 %50 }
  0x89   :  { %v64_v9 = vpop.permute.xlu1 %63  ;;  %v53_v10 = vpop.permute.xlu0 %52 }
  0x8a   :  { %v66_v11 = vsel %vm65_vm0, %v62_v7, %v64_v9  ;;  %v67_v12 = vsel %vm65_vm0, %v64_v9, %v62_v7  ;;  %v55_v13 = vsel %vm54_vm1, %v51_v8, %v53_v10  ;;  %v56_v14 = vsel %vm54_vm1, %v53_v10, %v51_v8 }
  0x8b   :  { %v70_v15 = vsel %vm68_vm2, -inf, %v67_v12  ;;  %v71_v16 = vsel %vm69_vm3, -inf, %v66_v11  ;;  %v59_v17 = vsel %vm57_vm4, -inf, %v55_v13  ;;  %v60_v18 = vsel %vm58_vm5, -inf, %v56_v14 }
  0x8c   :  { %v72_v19 = vmax.f32 %v59_v17, %v70_v15  ;;  %v73_v20 = vmax.f32 %v60_v18, %v71_v16 }
  0x8e   :  { %v75_v21 = vmax.f32 %v22_v1, %v73_v20  ;;  %v74_v22 = vmax.f32 %v208_v0, %v72_v19 }
  0x90   :  { %78 = vrot.lane.b32.xlu1 %v75_v21, %s183_s0  ;;  %76 = vrot.lane.b32.xlu0 %v74_v22, %s183_s0 }
  0x94   :  { %89 = vrot.lane.b32.xlu1 %v75_v21, %s184_s20  ;;  %87 = vrot.lane.b32.xlu0 %v74_v22, %s184_s20 }
 0x102   :  { %v79_v23 = vpop.permute.xlu1 %78  ;;  %v77_v24 = vpop.permute.xlu0 %76 }
 0x103   :  { %v82_v25 = vsel %vm80_vm6, %v79_v23, %v77_v24  ;;  %v81_v31 = vsel %vm80_vm6, %v77_v24, %v79_v23 }
 0x104   :  { %v86_v28 = vsel %vm84_vm7, -inf, %v82_v25 }
 0x106   :  { %v90_v26 = vpop.permute.xlu1 %89  ;;  %v88_v27 = vpop.permute.xlu0 %87 }
 0x107   :  { %v92_v29 = vsel %vm91_vm8, %v88_v27, %v90_v26  ;;  %v93_v30 = vsel %vm91_vm8, %v90_v26, %v88_v27 }
 0x108   :  { %v95_v32 = vsel %vm91_vm8, -inf, %v93_v30  ;;  %v98_v33 = vmax.f32 %v86_v28, %v92_v29 }
 0x109   :  { %v97_v34 = vmax.f32 %v81_v31, %v95_v32 }
 0x10a   :  { %v100_v35 = vmax.f32 %v75_v21, %v98_v33 }
 0x10b   :  { %v99_v36 = vmax.f32 %v74_v22, %v97_v34 }
 0x10c   :  { %v102_v37 = vsub.f32 %v100_v35, %v22_v1 }
 0x10d   :  { %v101_v38 = vsub.f32 %v99_v36, %v208_v0 }
 0x10e   :  { %v124_v39 = vtrunc.f32 %v102_v37 }
 0x10f   :  { %v122_v40 = vtrunc.f32 %v101_v38 }
 0x110   :  { %v125_v41 = vcvt.f32.s32 %v124_v39 }
 0x111   :  { %v123_v42 = vcvt.f32.s32 %v122_v40 }
 0x112   :  { %106 = vst [vmem:[#allocation5 + $0x8] sm:$0xff] %v125_v41 }
 0x113   :  { %105 = vst [vmem:[#allocation5] sm:$0xff] %v123_v42 }
 0x114   :  { %165 = shalt.err (!%p162_p12)
}
 0x115   :  { %s166_s26 = scalar_lea.hbm %s227_s1, 256 }
 0x116   :  { %p167_p13 = scmp.ne.s32.totalorder %s227_s1, %s166_s26  ;;  %p170_p0 = scmp.lt.u32.totalorder %s166_s26, %s227_s1 }
 0x118   :  { %p172_p1 = pnand %p170_p0, %p167_p13 }
 0x11a   :  { %175 = shalt.err (!%p172_p1)
}
 0x11b   :  { %116 = dma.vmem_to_hbm [thread:$0]  %s114_s22, 256, %s227_s1, [#allocation4]  }
 0x11c   :  { %178 = dma.done.wait [#allocation4], 256  }
 0x11d   :  { %179 = vsyncadd [#allocation4], 4294967040 }
 0x11e   :  { %120 = vsyncpa [#allocation3], 1 }
 0x11f   :  { %121 = vsyncpa [#allocation4], 1 }

</bundles_post_ra>
